<compile_context>
chip_gen: v7x
topology: tpu7x:2x2x1
jax: 0.10.0
libtpu: 0.0.40
codegen_flags: <defaults>
</compile_context>

<pallas_src>
import jax
import jax.numpy as jnp
from jax.experimental import pallas as pl
from jax.experimental.pallas import tpu as pltpu

_LANE = 128


def _round_up(v, m):
    return (v + m - 1) // m * m


def _sublane_pack(itemsize):
    # sub-32-bit dtypes pack along sublanes: 8 rows (f32), 16 (bf16), 32 (int8/fp8)
    return 8 * max(1, 4 // max(1, itemsize))


def _largest_divisor_leq(n, cap):
    cap = max(1, min(n, cap))
    for d in range(cap, 0, -1):
        if n % d == 0:
            return d
    return 1


def _vmem_limit_bytes():
    # Generation-aware scoped-VMEM limit: half of physical VMEM per TensorCore
    # (128 MiB on v5e/v6e, 64 MiB on v7x), conservative fallback if query fails.
    cap = 64 * 1024 * 1024
    try:
        cap = int(pltpu.get_tpu_info().vmem_capacity_bytes)
    except Exception:
        pass
    return min(cap // 2, 96 * 1024 * 1024)


def _max_sigmoid_kernel_4d(x_ref, o_ref):
    # x_ref: (1, c_tile, tr, 128). Channel is a LEADING dim -> the reduction is
    # pure VPU vmax; sigmoid goes to the EUP (separate bundle slot).
    c = pl.program_id(2)
    m = jnp.max(x_ref[...], axis=1, keepdims=True)            # (1, 1, tr, 128)

    @pl.when(c == 0)
    def _():
        o_ref[...] = m

    @pl.when(c > 0)
    def _():
        o_ref[...] = jnp.maximum(o_ref[...], m)                # output-resident running max

    @pl.when(c == pl.num_programs(2) - 1)
    def _():
        o_ref[...] = jax.nn.sigmoid(o_ref[...].astype(jnp.float32)).astype(o_ref.dtype)


def _max_sigmoid_kernel_3d(x_ref, o_ref):
    # x_ref: (1, C, ts). Channel sits on the sublane axis -> XLU sublane reduce,
    # which is free filler under the HBM DMA for this bandwidth-bound kernel.
    m = jnp.max(x_ref[...], axis=1, keepdims=True)             # (1, 1, ts)
    o_ref[...] = jax.nn.sigmoid(m.astype(jnp.float32)).astype(o_ref.dtype)


def spatial_attention(x):
    """x: (N, C, H, W) -> (N, 1, H, W) == sigmoid(max over channel dim)."""
    N, C, H, W = x.shape
    S = H * W
    itemsize = jnp.dtype(x.dtype).itemsize
    sub = _sublane_pack(itemsize)
    granule = _LANE * sub                       # elements per full (sublane, lane) tile

    vmem_limit = _vmem_limit_bytes()
    budget = int(vmem_limit * 0.75)             # bytes for double-buffered in+out blocks
    input_buf_cap = 8 * 1024 * 1024             # ~8 MiB per input buffer (HBM roofline)

    if S % _LANE == 0:
        # ---------- lane-dense 4-D path: free view (N, C, S/128, 128) ----------
        r_total = S // _LANE

        # Channel tile: largest divisor of C that still allows a granule-sized
        # spatial tile inside the budget (divisor -> no ragged C block, which
        # would contaminate the max with out-of-bounds garbage).
        c_cap = max(1, budget // (2 * granule * itemsize) - 1)
        c_tile = _largest_divisor_leq(C, c_cap)
        num_c_tiles = C // c_tile

        # Spatial tile (elements), sized by bytes: VMEM budget + per-buffer cap.
        ts_budget = budget // (2 * (c_tile + 1) * itemsize)
        ts_cap = input_buf_cap // (c_tile * itemsize)
        elems = (min(ts_budget, ts_cap) // granule) * granule
        tr = max(sub, elems // _LANE)
        if tr >= r_total:
            tr = r_total                        # single full-extent spatial tile (legal)
            if N == 1 and r_total > sub:        # keep >=2 parallel steps for v7x dual-TC
                tr = _round_up(pl.cdiv(r_total, 2), sub)
        num_tiles = pl.cdiv(r_total, tr)        # ragged last block OK (writes masked)

        x4 = x.reshape(N, C, r_total, _LANE)    # free view: no HBM copy
        out4 = pl.pallas_call(
            _max_sigmoid_kernel_4d,
            out_shape=jax.ShapeDtypeStruct((N, 1, r_total, _LANE), x.dtype),
            grid_spec=pltpu.PrefetchScalarGridSpec(
                num_scalar_prefetch=0,
                grid=(N, num_tiles, num_c_tiles),
                in_specs=[pl.BlockSpec((1, c_tile, tr, _LANE),
                                       lambda n, t, c: (n, c, t, 0))],
                out_specs=pl.BlockSpec((1, 1, tr, _LANE),
                                       lambda n, t, c: (n, 0, t, 0)),
            ),
            compiler_params=pltpu.CompilerParams(
                dimension_semantics=("parallel", "parallel", "arbitrary"),
                vmem_limit_bytes=vmem_limit,
            ),
        )(x4)
        return out4.reshape(N, 1, H, W)

    # ---------- ragged 3-D path (S not 128-aligned): free view (N, C, S) ----------
    # No pad copy; the last spatial block is ragged (garbage only lands in
    # positions whose writes are masked).
    c_eff = _round_up(C, sub)                   # sublane padding of the VMEM tile
    ts_budget = budget // (2 * (c_eff + 1) * itemsize)
    ts_cap = input_buf_cap // (C * itemsize)
    ts = max(_LANE, (min(ts_budget, ts_cap) // _LANE) * _LANE)
    if ts >= S:
        ts = S                                  # full-extent lane block (legal, any S)
        if N == 1 and S > 2 * _LANE:            # keep >=2 parallel steps for v7x dual-TC
            ts = _round_up(pl.cdiv(S, 2), _LANE)
    num_tiles = pl.cdiv(S, ts)
    # TODO(synk): for extreme channel counts this path keeps full C per block;
    # spatial tile shrinks instead of tiling C (fine for typical C).

    x3 = x.reshape(N, C, S)                     # free view: no HBM copy
    out3 = pl.pallas_call(
        _max_sigmoid_kernel_3d,
        out_shape=jax.ShapeDtypeStruct((N, 1, S), x.dtype),
        grid_spec=pltpu.PrefetchScalarGridSpec(
            num_scalar_prefetch=0,
            grid=(N, num_tiles),
            in_specs=[pl.BlockSpec((1, C, ts), lambda n, t: (n, 0, t))],
            out_specs=pl.BlockSpec((1, 1, ts), lambda n, t: (n, 0, t)),
        ),
        compiler_params=pltpu.CompilerParams(
            dimension_semantics=("parallel", "parallel"),
            vmem_limit_bytes=vmem_limit,
        ),
    )(x3)
    return out3.reshape(N, 1, H, W)


if __name__ == "__main__":
    key = jax.random.PRNGKey(0)

    # Path A: 128-aligned spatial extent (16*16 = 256).
    x = jax.random.normal(key, (2, 4, 16, 16), dtype=jnp.float32)
    out = spatial_attention(x)
    jax.block_until_ready(out)
    ref = jax.nn.sigmoid(jnp.max(x, axis=1, keepdims=True))
    assert out.shape == (2, 1, 16, 16)
    assert jnp.allclose(out, ref, atol=1e-6), "mismatch vs reference (aligned path)"

    # Path B: non-128-aligned spatial extent (10*13 = 130), no pad copy.
    x2 = jax.random.normal(jax.random.PRNGKey(1), (2, 6, 10, 13), dtype=jnp.float32)
    out2 = spatial_attention(x2)
    jax.block_until_ready(out2)
    ref2 = jax.nn.sigmoid(jnp.max(x2, axis=1, keepdims=True))
    assert out2.shape == (2, 1, 10, 13)
    assert jnp.allclose(out2, ref2, atol=1e-6), "mismatch vs reference (ragged path)"

    print("KERNEL_OK")
</pallas_src>

<mosaic_0001>
module attributes {stable_mosaic.version = 11 : i64} {
  func.func @_max_sigmoid_kernel_4d(%arg0: i32, %arg1: i32, %arg2: i32, %arg3: memref<1x4x2x128xf32, #tpu.memory_space<vmem>>, %arg4: memref<1x1x2x128xf32, #tpu.memory_space<vmem>>) attributes {dimension_semantics = [#tpu.dimension_semantics<parallel>, #tpu.dimension_semantics<parallel>, #tpu.dimension_semantics<arbitrary>], iteration_bounds = array<i64: 2, 1, 1>, scalar_prefetch = 0 : i64, scratch_operands = 0 : i64, tpu.core_type = #tpu.core_type<tc>, window_params = [{transform_indices = @transform_0, window_bounds = array<i64: 1, 4, 2, 128>}, {transform_indices = @transform_1, window_bounds = array<i64: 1, 1, 2, 128>}]} {
    %c0 = arith.constant 0 : index
    %c0_0 = arith.constant 0 : index
    %c0_1 = arith.constant 0 : index
    %c0_2 = arith.constant 0 : index
    %0 = vector.load %arg3[%c0, %c0_0, %c0_1, %c0_2] : memref<1x4x2x128xf32, #tpu.memory_space<vmem>>, vector<1x4x2x128xf32>
    %cst = arith.constant dense<0xFF800000> : vector<1x2x128xf32>
    %1 = vector.multi_reduction <maximumf>, %0, %cst [1] : vector<1x4x2x128xf32> to vector<1x2x128xf32>
    %2 = vector.shape_cast %1 : vector<1x2x128xf32> to vector<1x1x2x128xf32>
    %c0_i32 = arith.constant 0 : i32
    %3 = arith.cmpi eq, %arg2, %c0_i32 : i32
    %4 = arith.extui %3 : i1 to i32
    %c0_i32_3 = arith.constant 0 : i32
    %5 = arith.cmpi ne, %4, %c0_i32_3 : i32
    scf.if %5 {
      %c0_8 = arith.constant 0 : index
      %c0_9 = arith.constant 0 : index
      %c0_10 = arith.constant 0 : index
      %c0_11 = arith.constant 0 : index
      %12 = vector.load %arg4[%c0_8, %c0_9, %c0_10, %c0_11] : memref<1x1x2x128xf32, #tpu.memory_space<vmem>>, vector<1x1x2x128xf32>
      tpu.vector_store %arg4[%c0_8, %c0_9, %c0_10, %c0_11], %2 {strides = array<i32>} : memref<1x1x2x128xf32, #tpu.memory_space<vmem>>, vector<1x1x2x128xf32>,
    } else {
    }
    %c0_i32_4 = arith.constant 0 : i32
    %6 = arith.cmpi sgt, %arg2, %c0_i32_4 : i32
    %7 = arith.extui %6 : i1 to i32
    %c0_i32_5 = arith.constant 0 : i32
    %8 = arith.cmpi ne, %7, %c0_i32_5 : i32
    scf.if %8 {
      %c0_8 = arith.constant 0 : index
      %c0_9 = arith.constant 0 : index
      %c0_10 = arith.constant 0 : index
      %c0_11 = arith.constant 0 : index
      %12 = vector.load %arg4[%c0_8, %c0_9, %c0_10, %c0_11] : memref<1x1x2x128xf32, #tpu.memory_space<vmem>>, vector<1x1x2x128xf32>
      %13 = arith.maximumf %12, %2 : vector<1x1x2x128xf32>
      %c0_12 = arith.constant 0 : index
      %c0_13 = arith.constant 0 : index
      %c0_14 = arith.constant 0 : index
      %c0_15 = arith.constant 0 : index
      %14 = vector.load %arg4[%c0_12, %c0_13, %c0_14, %c0_15] : memref<1x1x2x128xf32, #tpu.memory_space<vmem>>, vector<1x1x2x128xf32>
      tpu.vector_store %arg4[%c0_12, %c0_13, %c0_14, %c0_15], %13 {strides = array<i32>} : memref<1x1x2x128xf32, #tpu.memory_space<vmem>>, vector<1x1x2x128xf32>,
    } else {
    }
    %c0_i32_6 = arith.constant 0 : i32
    %9 = arith.cmpi eq, %arg2, %c0_i32_6 : i32
    %10 = arith.extui %9 : i1 to i32
    %c0_i32_7 = arith.constant 0 : i32
    %11 = arith.cmpi ne, %10, %c0_i32_7 : i32
    scf.if %11 {
      %c0_8 = arith.constant 0 : index
      %c0_9 = arith.constant 0 : index
      %c0_10 = arith.constant 0 : index
      %c0_11 = arith.constant 0 : index
      %12 = vector.load %arg4[%c0_8, %c0_9, %c0_10, %c0_11] : memref<1x1x2x128xf32, #tpu.memory_space<vmem>>, vector<1x1x2x128xf32>
      %13 = arith.negf %12 : vector<1x1x2x128xf32>
      %14 = math.exp %13 : vector<1x1x2x128xf32>
      %cst_12 = arith.constant 1.000000e+00 : f32
      %15 = vector.broadcast %cst_12 : f32 to vector<1x1x2x128xf32>
      %16 = arith.addf %15, %14 : vector<1x1x2x128xf32>
      %17 = arith.divf %15, %16 : vector<1x1x2x128xf32>
      %c0_13 = arith.constant 0 : index
      %c0_14 = arith.constant 0 : index
      %c0_15 = arith.constant 0 : index
      %c0_16 = arith.constant 0 : index
      %18 = vector.load %arg4[%c0_13, %c0_14, %c0_15, %c0_16] : memref<1x1x2x128xf32, #tpu.memory_space<vmem>>, vector<1x1x2x128xf32>
      tpu.vector_store %arg4[%c0_13, %c0_14, %c0_15, %c0_16], %17 {strides = array<i32>} : memref<1x1x2x128xf32, #tpu.memory_space<vmem>>, vector<1x1x2x128xf32>,
    } else {
    }
    return
  }
  func.func @transform_0(%arg0: i32, %arg1: i32, %arg2: i32) -> (i32, i32, i32, i32) {
    %c0_i32 = arith.constant 0 : i32
    %c0_i32_0 = arith.constant 0 : i32
    return %arg0, %arg2, %arg1, %c0_i32 : i32, i32, i32, i32
  }
  func.func @transform_1(%arg0: i32, %arg1: i32, %arg2: i32) -> (i32, i32, i32, i32) {
    %c0_i32 = arith.constant 0 : i32
    %c0_i32_0 = arith.constant 0 : i32
    %c0_i32_1 = arith.constant 0 : i32
    return %arg0, %c0_i32, %arg1, %c0_i32_0 : i32, i32, i32, i32
  }
}

</mosaic_0001>

<bundles_post_ra>
// kernel: tpu_custom_call.1
= control target key start
LH: loop header
LB: loop body
LE: loop exit
PB: predicated region body
PF: predicated region fallthrough
CT: control target
= control target key end

     0   :  { %6 = vsyncpa [#allocation3], 0  ;;  %s686_s0 = inlined_call_operand.hbm [shape: f32[2,4,2,128], index: 0, kind: input, shape index: {}]   ;;  %s687_s1 = inlined_call_operand.hbm [shape: f32[2,1,2,128], index: 1, kind: output, shape index: {}]  }
   0x1   :  { %8 = vsyncpa [#allocation3 + $0x1], 0 }
   0x2   :  { %9 = vsyncpa [#allocation4], 0 }
   0x3   :  { %11 = vsyncpa [#allocation4 + $0x1], 0  ;;  %s512_s6 = smov 0   ;;  %s514_s7 = smov 0  }
   0x4   :  { %s516_s8 = smov 0   ;;  %s518_s9 = smov 0  }
   0x5   :  { %s520_s10 = smov 0   ;;  %s522_s11 = smov 0  }
   0x6 LB: > { %s300_s12 = sadd.s32 4294967295, %s496_s11   ;;  %s301_s13 = sadd.s32 4294967294, %s496_s11   ;;  %s496_s11 = sphi %s522_s11, %s17_s11   ;;  %s492_s10 = sphi %s520_s10, %s702_s10   ;;  %s488_s9 = sphi %s518_s9, %s701_s9   ;;  %s484_s8 = sphi %s516_s8, %s700_s8   ;;  %s480_s7 = sphi %s514_s7, %s699_s7   ;;  %s476_s6 = sphi %s512_s6, %s698_s6  }
   0x7   : > { %s36_s14 = sadd.s32 1, %s492_s10  ;;  %s47_s15 = sadd.s32 1, %s484_s8 }
   0x8   : > { %p38_p0 = scmp.ge.s32.totalorder %s36_s14, 2  ;;  %p54_p1 = scmp.ne.s32.totalorder %s484_s8, %s480_s7 }
   0x9   : > { %p55_p2 = scmp.eq.s32.totalorder %s496_s11, 0  ;;  %p60_p3 = scmp.ne.s32.totalorder %s480_s7, %s476_s6 }
   0xa   : > { %s704_s14 = smov (%p38_p0, %s36_s14), 0  ;;  %p61_p5 = scmp.eq.s32.totalorder %s300_s12, 0 }
   0xb   : > { %p553_p4 = por %p55_p2, %p54_p1  ;;  %s40_s17 = ssub.s32 %s492_s10, %s704_s14 }
   0xc   : > { %p86_p6 = scmp.eq.s32.totalorder %s300_s12, 1  ;;  %p45_p7 = scmp.eq.s32.totalorder %s40_s17, 0 }
   0xd   : > { %p559_p8 = por %p61_p5, %p60_p3  ;;  %p92_p10 = scmp.eq.s32.totalorder %s301_s13, 1 }
   0xe   : > { %p563_p9 = por %p86_p6, %p54_p1  ;;  %p328_p13 = scmp.lt.s32.totalorder %s496_s11, 2 }
   0xf   : > { %s568_s20 = scalar_select %p45_p7, %s484_s8, %s47_s15  }
  0x10   : > { %s691_s19 = scalar_select %p563_p9, 1, 0 }
  0x11   : > { %p570_p11 = por %p92_p10, %p60_p3  ;;  %s112_s22 = sand.u32 1, %s484_s8  }
  0x12   : > { %s304_s23 = sshll.u32 %s112_s22, 3  ;;  %s315_s24 = sshll.u32 %s492_s10, 7 }
  0x13   : > { %s692_s21 = scalar_select %p570_p11, 1, 0 }
  0x14   : > { %s581_s27 = scalar_lea.hbm %s686_s0, %s315_s24  ;;  %s116_s28 = scalar_lea.vmem [#allocation2], %s304_s23 }
  0x15   : > { %s126_s29 = sshll.u32 %s116_s28, 4  ;;  %p587_p0 = pnand %p328_p13, %p553_p4  ;;  %s583_s29 = int_to_ptr.vmem [resolvable:$true] %s126_s29 }
  0x16   : > { %s592_s2 = scalar_lea.sflag [#allocation3], %s112_s22  ;;  %s384_s3 = scalar_lea.hbm %s581_s27, 128 }
  0x17   : > { %p385_p2 = scmp.ne.s32.totalorder %s581_s27, %s384_s3  ;;  %p386_p3 = pneg %p587_p0 }
  0x18   : > { %s389_s12 = scalar_lea.hbm %s686_s0, 256  ;;  %p390_p4 = scmp.lt.u32.totalorder %s581_s27, %s686_s0 }
  0x19   : > { %p387_p5 = pnand %p386_p3, %p385_p2  ;;  %p391_p7 = scmp.lt.u32.totalorder %s389_s12, %s384_s3 }
  0x1a   : > { %p393_p13 = scmp.lt.u32.totalorder %s384_s3, %s581_s27 }
  0x1b   : > { %p388_p6 = pneg %p387_p5  ;;  %p392_p10 = por %p391_p7, %p390_p4 }
  0x1d   : > { %p394_p12 = por %p393_p13, %p392_p10 }
  0x1f   : > { %p395_p1 = pnand %p394_p12, %p388_p6 }
  0x21   : > { %398 = shalt.err (!%p395_p1)
}
  0x22   : > { %s399_s16 = scalar_lea.vmem %s583_s29, 128  ;;  %s498_s17 = smov [#allocation2]  }
  0x23   : > { %p400_p2 = scmp.ne.s32.totalorder %s583_s29, %s399_s16  ;;  %s404_s22 = sshll.u32 %s498_s17, 4  ;;  %s405_s22 = int_to_ptr.vmem [resolvable:$false] %s404_s22 }
  0x24   : > { %s406_s23 = scalar_lea.vmem %s405_s22, 256  ;;  %p407_p9 = scmp.lt.s32.totalorder %s583_s29, %s405_s22 }
  0x25   : > { %p402_p5 = pnand %p400_p2, %p386_p3  ;;  %p408_p4 = scmp.lt.s32.totalorder %s406_s23, %s399_s16 }
  0x27   : > { %p403_p11 = pneg %p402_p5  ;;  %p409_p7 = por %p408_p4, %p407_p9 }
  0x29   : > { %p410_p10 = pnand %p409_p7, %p403_p11 }
  0x2b   : > { %413 = shalt.err (!%p410_p10)
}
  0x2c   : > { %s499_s24 = smov 32   ;;  %s500_s25 = smov 2  }
  0x2d   : > { %323 = dma.hbm_to_vmem [thread:$0]  (!%p587_p0), %s581_s27, 128, %s583_s29, %s592_s2, %s499_s24, %s499_s24, %s500_s25  }
  0x2e   : > { %p134_p12 = scmp.lt.s32.totalorder %s496_s11, 3  ;;  %p694_p1 = scmp.ge.s32.totalorder %s496_s11, 1 }
  0x30   : > { %p135_p3 = pnand %p694_p1, %p134_p12 }
  0x31   : > { %s624_s26 = sand.u32 (!%p135_p3), 1, %s480_s7  }
  0x32   : > { %138 = sbr.rel (%p135_p3) target bundleno = 113 (0x71), region = 24  ;;  %s308_s28 = sshll.u32 (!%p135_p3), %s624_s26, 3 }
  0x33   : > { %s141_s3 = scalar_lea.sflag (!%p135_p3), [#allocation3], %s624_s26  ;;  %s144_s4 = scalar_lea.vmem (!%p135_p3), [#allocation2], %s308_s28 }
  0x39   : > { %467 = dma.done.wait (%p559_p8), %s141_s3, 128  }
  0x3a   : > { %469 = vsyncadd (%p559_p8), %s141_s3, 4294967168  ;;  %vm168_vm0 = vcmask 1041408   ;;  %v164_v0 = vld [vmem:[%s144_s4] sm:$0x3]  ;;  %v165_v1 = vld [vmem:[%s144_s4 + $0x2] sm:$0x3] }
  0x3b   : > { %v166_v2 = vld [vmem:[%s144_s4 + $0x4] sm:$0x3]  ;;  %s309_s27 = sshll.u32 %s624_s26, 1  ;;  %v167_v3 = vld [vmem:[%s144_s4 + $0x6] sm:$0x3]  ;;  %v169_v4 = vsel %vm168_vm0, %v164_v0, -inf }
  0x3c   : > { %v170_v5 = vsel %vm168_vm0, %v165_v1, -inf  ;;  %v171_v6 = vsel %vm168_vm0, %v166_v2, -inf  ;;  %v172_v7 = vsel %vm168_vm0, %v167_v3, -inf  ;;  %s162_s29 = scalar_lea.vmem [#allocation5], %s309_s27  ;;  %s312_s18 = sshll.u32 %s488_s9, 5 }
  0x3d   : > { %v173_v8 = vmax.f32 %v169_v4, %v170_v5  ;;  %v174_v9 = vmax.f32 %v171_v6, %v172_v7  ;;  %s214_s30 = sshll.u32 %s162_s29, 4  ;;  %s637_s12 = scalar_lea.hbm %s687_s1, %s312_s18  ;;  %s639_s30 = int_to_ptr.vmem [resolvable:$true] %s214_s30 }
  0x3e   : > { %s200_s13 = scalar_lea.sflag [#allocation4], %s624_s26  ;;  %s414_s15 = scalar_lea.vmem %s639_s30, 32 }
  0x3f   : > { %v175_v10 = vmax.f32 %v173_v8, %v174_v9  ;;  %p415_p8 = scmp.ne.s32.totalorder %s639_s30, %s414_s15  ;;  %p695_p9 = scmp.ne.s32.totalorder %s691_s19, 0 }
  0x40   : > { %s501_s9 = smov [#allocation5]  }
  0x41   : > { %180 = vst [vmem:[%s162_s29] sm:$0x3] %v175_v10  ;;  %p416_p11 = pnand %p415_p8, %p695_p9  ;;  %s418_s16 = sshll.u32 %s501_s9, 4  ;;  %s419_s16 = int_to_ptr.vmem [resolvable:$false] %s418_s16 }
  0x42   : > { %s420_s17 = scalar_lea.vmem %s419_s16, 64  ;;  %p421_p6 = scmp.lt.s32.totalorder %s639_s30, %s419_s16 }
  0x43   : > { %p417_p0 = pneg %p416_p11  ;;  %p422_p13 = scmp.lt.s32.totalorder %s420_s17, %s414_s15 }
  0x45   : > { %p423_p2 = por %p422_p13, %p421_p6 }
  0x47   : > { %p424_p5 = pnand %p423_p2, %p417_p0 }
  0x48   : > { %v191_v11 = vld [vmem:[%s162_s29] sm:$0x3] }
  0x49   : > { %v310_v12 = vmul.f32 -1.442695, %v191_v11 }
  0x4b   : > { %380 = vpow2.f32 %v310_v12 }
  0x55   : > { %v381_v13 = vpop.eup %380 }
  0x56   : > { %v195_v14 = vadd.f32 1.0, %v381_v13 }
  0x58   : > { %382 = vrcp.f32 %v195_v14 }
  0x62   : > { %v383_v15 = vpop.eup %382 }
  0x63   : > { %198 = vst [vmem:[%s162_s29] sm:$0x3] %v383_v15 }
  0x64   : > { %427 = shalt.err (!%p424_p5)
}
  0x65   : > { %s428_s22 = scalar_lea.hbm %s637_s12, 32  ;;  %s432_s25 = scalar_lea.hbm %s687_s1, 64 }
  0x66   : > { %p429_p4 = scmp.ne.s32.totalorder %s637_s12, %s428_s22  ;;  %p433_p12 = scmp.lt.u32.totalorder %s637_s12, %s687_s1 }
  0x67   : > { %p434_p1 = scmp.lt.u32.totalorder %s432_s25, %s428_s22  ;;  %p436_p8 = scmp.lt.u32.totalorder %s428_s22, %s637_s12 }
  0x68   : > { %p430_p7 = pnand %p429_p4, %p695_p9 }
  0x69   : > { %p435_p3 = por %p434_p1, %p433_p12 }
  0x6a   : > { %p431_p10 = pneg %p430_p7 }
  0x6b   : > { %p437_p11 = por %p436_p8, %p435_p3 }
  0x6d   : > { %p438_p0 = pnand %p437_p11, %p431_p10 }
  0x6f   : > { %441 = shalt.err (!%p438_p0)
}
  0x70   : > { %318 = dma.vmem_to_hbm [thread:$0]  (%p695_p9), %s639_s30, 32, %s637_s12, %s200_s13  }
  0x71 PF: > { %s226_s3 = sand.u32 1, %s476_s6   ;;  %p696_p6 = scmp.ne.s32.totalorder %s692_s21, 0 }
  0x72   : > { %p697_p13 = scmp.ge.s32.totalorder %s496_s11, 2  ;;  %s227_s4 = scalar_lea.sflag [#allocation4], %s226_s3 }
  0x74   : > { %p325_p2 = pnand %p697_p13, %p696_p6 }
  0x76   : > { %471 = dma.done.wait (!%p325_p2), %s227_s4, 32  }
  0x77   : > { %473 = vsyncadd (!%p325_p2), %s227_s4, 4294967264  ;;  %s17_s11 = sadd.s32 1, %s496_s11   ;;  %s698_s6 = smov %s480_s7 }
  0x78   : > { %p14_p5 = scmp.ge.s32.totalorder %s17_s11, 4   ;;  %s699_s7 = smov %s484_s8 }
  0x79   : > { %s700_s8 = smov %s568_s20  ;;  %s701_s9 = smov %s492_s10 }
  0x7a   : > { %s702_s10 = smov %s704_s14  ;;  %16 = sbr.rel (!%p14_p5) target bundleno = 6 (0x6), region = 81 }
  0x81   :  { %232 = vsyncpa [#allocation3], 1 }
  0x82   :  { %234 = vsyncpa [#allocation3 + $0x1], 1 }
  0x83   :  { %235 = vsyncpa [#allocation4], 1 }
  0x84   :  { %237 = vsyncpa [#allocation4 + $0x1], 1 }

</bundles_post_ra>
